<compile_context>
chip_gen: v7x
topology: tpu7x:2x2x1
jax: 0.10.0
libtpu: 0.0.40
codegen_flags: <defaults>
</compile_context>

<pallas_src>
import functools

import jax
import jax.numpy as jnp
from jax.experimental import pallas as pl
from jax.experimental.pallas import tpu as pltpu


def _round_up(x: int, m: int) -> int:
    return ((x + m - 1) // m) * m


def _chip_tuning():
    """Per-generation tuning. v7x-class (<=64 MiB VMEM/TC) gets tighter tiles."""
    vmem_bytes = None
    try:
        vmem_bytes = pltpu.get_tpu_info().vmem_capacity_bytes
    except Exception:
        vmem_bytes = None
    if vmem_bytes is not None and vmem_bytes <= (64 << 20):
        # v7x: 64 MiB VMEM per TC, 2 TCs per chip.
        return {"work_budget": 20 << 20, "vmem_limit": 32 << 20, "two_blocks": True}
    # v5e / v6e: 128 MiB physical VMEM -> bigger blocks to hit the HBM roofline.
    return {"work_budget": 48 << 20, "vmem_limit": 64 << 20, "two_blocks": False}


def _choose_tile_n(n: int, c: int, itemsize: int, work_budget: int,
                   two_blocks: bool) -> int:
    """Rows per block, sized by per-step working set (not just the DMA block)."""
    # Double-buffered input block (HBM dtype) + ~4 C-wide f32 intermediates
    # (x_f32, exp(x-m), coef, x*coef).
    bytes_per_row = 2 * c * itemsize + 4 * c * 4
    rows = max(8, (work_budget // max(1, bytes_per_row)) // 8 * 8)
    rows = min(rows, 1024)                       # per-step overhead tiny past this
    if two_blocks and n >= 16:
        # v7x: guarantee >= 2 grid steps so both TensorCores get work.
        rows = min(rows, _round_up(pl.cdiv(n, 2), 8))
    if rows >= n:
        rows = n                                 # single block == full array dim
    return rows


def _make_lsce_kernel(smoothing: float, n_valid: int, tile_n: int, num_classes: int):
    confidence = 1.0 - smoothing
    smooth_over_c = smoothing / float(num_classes)

    def kernel(logits_ref, labels_ref, out_ref):
        # logits_ref: (tile_n, C)   labels_ref: (tile_n, 1) int32
        # out_ref:    (1, 8, 128)   lane-dense per-block partial sum
        x = logits_ref[...].astype(jnp.float32)                      # (tile_n, C)
        labels = labels_ref[...]                                     # (tile_n, 1)

        # Stable logsumexp pieces (only (tile_n, 1) row stats kept around).
        m = jnp.max(x, axis=-1, keepdims=True)                       # (tile_n, 1)
        lse = jnp.log(jnp.sum(jnp.exp(x - m), axis=-1, keepdims=True))

        # Fused gather + mean term: one weighted row reduction, no one_hot.
        col = jax.lax.broadcasted_iota(jnp.int32, x.shape, 1)        # (tile_n, C)
        coef = jnp.where(col == labels, confidence + smooth_over_c, smooth_over_c)
        weighted = jnp.sum(x * coef, axis=-1, keepdims=True)         # (tile_n, 1)

        # Folded loss: confidence*nll + smoothing*smooth, log_probs never built.
        row_loss = (m + lse) - weighted                              # (tile_n, 1)

        # Mask rows beyond N (ragged last block: garbage rows -> exactly 0,
        # NaN/Inf cannot leak through a select).
        row = jax.lax.broadcasted_iota(jnp.int32, (tile_n, 1), 0)
        global_row = pl.program_id(0) * tile_n + row
        row_loss = jnp.where(global_row < n_valid, row_loss, jnp.float32(0.0))

        block_sum = jnp.sum(row_loss)                                # scalar
        out_ref[...] = jnp.broadcast_to(block_sum, out_ref.shape)

    return kernel


@functools.partial(jax.jit, static_argnames=("smoothing",))
def label_smooth_cross_entropy(logits, labels, smoothing: float = 0.1):
    """logits: (N, C) float, labels: (N,) int -> scalar f32 loss."""
    n, c = logits.shape
    itemsize = jnp.dtype(logits.dtype).itemsize
    tuning = _chip_tuning()
    tile_n = _choose_tile_n(n, c, itemsize, tuning["work_budget"],
                            tuning["two_blocks"])
    num_blocks = pl.cdiv(n, tile_n)

    labels2d = labels.astype(jnp.int32).reshape(n, 1)

    cost = pl.CostEstimate(
        flops=5 * n * c,
        transcendentals=n * c,
        bytes_accessed=n * c * itemsize + n * 4 + num_blocks * 8 * 128 * 4,
    )

    partials = pl.pallas_call(
        _make_lsce_kernel(smoothing, n, tile_n, c),
        out_shape=jax.ShapeDtypeStruct((num_blocks, 8, 128), jnp.float32),
        grid_spec=pltpu.PrefetchScalarGridSpec(
            num_scalar_prefetch=0,
            grid=(num_blocks,),
            in_specs=[
                pl.BlockSpec((tile_n, c), lambda i: (i, 0)),
                pl.BlockSpec((tile_n, 1), lambda i: (i, 0)),
            ],
            out_specs=pl.BlockSpec((1, 8, 128), lambda i: (i, 0, 0)),
        ),
        compiler_params=pltpu.CompilerParams(
            dimension_semantics=("parallel",),
            vmem_limit_bytes=tuning["vmem_limit"],
        ),
        cost_estimate=cost,
    )(logits, labels2d)

    # Tiny finalize: sum of per-block partials / N.
    return jnp.sum(partials[:, 0, 0]) / jnp.float32(n)


def _reference(logits, labels, smoothing=0.1):
    confidence = 1.0 - smoothing
    log_probs = jax.nn.log_softmax(logits.astype(jnp.float32), axis=-1)
    nll = -jnp.take_along_axis(
        log_probs, labels[:, None].astype(jnp.int32), axis=-1
    )[:, 0]
    smooth = -jnp.mean(log_probs, axis=-1)
    return jnp.mean(confidence * nll + smoothing * smooth)


if __name__ == "__main__":
    key = jax.random.PRNGKey(0)
    k1, k2, k3, k4, k5, k6 = jax.random.split(key, 6)

    # Case 1: small aligned shapes.
    N1, C1 = 8, 32
    logits1 = jax.random.normal(k1, (N1, C1), dtype=jnp.float32)
    labels1 = jax.random.randint(k2, (N1,), 0, C1, dtype=jnp.int32)
    loss1 = label_smooth_cross_entropy(logits1, labels1, smoothing=0.1)
    jax.block_until_ready(loss1)
    ref1 = _reference(logits1, labels1, smoothing=0.1)
    assert jnp.allclose(loss1, ref1, atol=1e-5, rtol=1e-5), (loss1, ref1)

    # Case 2: batch not a multiple of 8 (single full-array block, no padding).
    N2, C2 = 13, 40
    logits2 = jax.random.normal(k3, (N2, C2), dtype=jnp.float32)
    labels2 = jax.random.randint(k4, (N2,), 0, C2, dtype=jnp.int32)
    loss2 = label_smooth_cross_entropy(logits2, labels2, smoothing=0.1)
    jax.block_until_ready(loss2)
    ref2 = _reference(logits2, labels2, smoothing=0.1)
    assert jnp.allclose(loss2, ref2, atol=1e-5, rtol=1e-5), (loss2, ref2)

    # Case 3: larger ragged batch (exercises the >=2-block path on v7x).
    N3, C3 = 203, 64
    logits3 = jax.random.normal(k5, (N3, C3), dtype=jnp.float32)
    labels3 = jax.random.randint(k6, (N3,), 0, C3, dtype=jnp.int32)
    loss3 = label_smooth_cross_entropy(logits3, labels3, smoothing=0.1)
    jax.block_until_ready(loss3)
    ref3 = _reference(logits3, labels3, smoothing=0.1)
    assert jnp.allclose(loss3, ref3, atol=1e-5, rtol=1e-5), (loss3, ref3)

    print("KERNEL_OK")
</pallas_src>

<mosaic_0001>
module attributes {stable_mosaic.version = 11 : i64} {
  func.func @kernel(%arg0: i32, %arg1: memref<8x32xf32, #tpu.memory_space<vmem>>, %arg2: memref<8x1xi32, #tpu.memory_space<vmem>>, %arg3: memref<1x8x128xf32, #tpu.memory_space<vmem>>) attributes {dimension_semantics = [#tpu.dimension_semantics<parallel>], iteration_bounds = array<i64: 1>, scalar_prefetch = 0 : i64, scratch_operands = 0 : i64, tpu.core_type = #tpu.core_type<tc>, window_params = [{transform_indices = @transform_0, window_bounds = array<i64: 8, 32>}, {transform_indices = @transform_1, window_bounds = array<i64: 8, 1>}, {transform_indices = @transform_2, window_bounds = array<i64: 1, 8, 128>}]} {
    %c0 = arith.constant 0 : index
    %c0_0 = arith.constant 0 : index
    %0 = vector.load %arg1[%c0, %c0_0] : memref<8x32xf32, #tpu.memory_space<vmem>>, vector<8x32xf32>
    %c0_1 = arith.constant 0 : index
    %c0_2 = arith.constant 0 : index
    %1 = vector.load %arg2[%c0_1, %c0_2] : memref<8x1xi32, #tpu.memory_space<vmem>>, vector<8x1xi32>
    %cst = arith.constant dense<0xFF800000> : vector<8xf32>
    %2 = vector.multi_reduction <maximumf>, %0, %cst [1] : vector<8x32xf32> to vector<8xf32>
    %3 = vector.shape_cast %2 : vector<8xf32> to vector<8x1xf32>
    %4 = vector.broadcast %3 : vector<8x1xf32> to vector<8x32xf32>
    %5 = arith.subf %0, %4 : vector<8x32xf32>
    %6 = math.exp %5 : vector<8x32xf32>
    %cst_3 = arith.constant dense<0.000000e+00> : vector<8xf32>
    %7 = vector.multi_reduction <add>, %6, %cst_3 [1] : vector<8x32xf32> to vector<8xf32>
    %8 = vector.shape_cast %7 : vector<8xf32> to vector<8x1xf32>
    %9 = math.log %8 : vector<8x1xf32>
    %10 = tpu.iota {dimensions = array<i32: 1>} : vector<8x32xi32>
    %11 = vector.broadcast %1 : vector<8x1xi32> to vector<8x32xi32>
    %12 = arith.cmpi eq, %10, %11 : vector<8x32xi32>
    %cst_4 = arith.constant 0.903124988 : f32
    %cst_5 = arith.constant 3.125000e-03 : f32
    %13 = vector.broadcast %cst_4 : f32 to vector<8x32xf32>
    %14 = vector.broadcast %cst_5 : f32 to vector<8x32xf32>
    %15 = arith.select %12, %13, %14 : vector<8x32xi1>, vector<8x32xf32>
    %16 = arith.mulf %0, %15 : vector<8x32xf32>
    %cst_6 = arith.constant dense<0.000000e+00> : vector<8xf32>
    %17 = vector.multi_reduction <add>, %16, %cst_6 [1] : vector<8x32xf32> to vector<8xf32>
    %18 = vector.shape_cast %17 : vector<8xf32> to vector<8x1xf32>
    %19 = arith.addf %3, %9 : vector<8x1xf32>
    %20 = arith.subf %19, %18 : vector<8x1xf32>
    %21 = tpu.iota {dimensions = array<i32: 0>} : vector<8x1xi32>
    %c8_i32 = arith.constant 8 : i32
    %22 = arith.muli %arg0, %c8_i32 : i32
    %23 = vector.broadcast %22 : i32 to vector<8x1xi32>
    %24 = arith.addi %23, %21 : vector<8x1xi32>
    %c8_i32_7 = arith.constant 8 : i32
    %25 = vector.broadcast %c8_i32_7 : i32 to vector<8x1xi32>
    %26 = arith.cmpi slt, %24, %25 : vector<8x1xi32>
    %cst_8 = arith.constant 0.000000e+00 : f32
    %27 = vector.broadcast %cst_8 : f32 to vector<8x1xf32>
    %28 = arith.select %26, %20, %27 : vector<8x1xi1>, vector<8x1xf32>
    %29 = vector.shape_cast %28 : vector<8x1xf32> to vector<1x8x1xf32>
    %cst_9 = arith.constant dense<0.000000e+00> : vector<1xf32>
    %30 = vector.multi_reduction <add>, %29, %cst_9 [1, 2] : vector<1x8x1xf32> to vector<1xf32>
    %31 = vector.shape_cast %30 : vector<1xf32> to vector<1x1x1xf32>
    %32 = vector.extract %31[0, 0, 0] : f32 from vector<1x1x1xf32>
    %33 = vector.broadcast %32 : f32 to vector<1x8x128xf32>
    %c0_10 = arith.constant 0 : index
    %c0_11 = arith.constant 0 : index
    %c0_12 = arith.constant 0 : index
    %34 = vector.load %arg3[%c0_10, %c0_11, %c0_12] : memref<1x8x128xf32, #tpu.memory_space<vmem>>, vector<1x8x128xf32>
    tpu.vector_store %arg3[%c0_10, %c0_11, %c0_12], %33 {strides = array<i32>} : memref<1x8x128xf32, #tpu.memory_space<vmem>>, vector<1x8x128xf32>,
    return
  }
  func.func @transform_0(%arg0: i32) -> (i32, i32) {
    %c0_i32 = arith.constant 0 : i32
    %c0_i32_0 = arith.constant 0 : i32
    return %arg0, %c0_i32 : i32, i32
  }
  func.func @transform_1(%arg0: i32) -> (i32, i32) {
    %c0_i32 = arith.constant 0 : i32
    %c0_i32_0 = arith.constant 0 : i32
    return %arg0, %c0_i32 : i32, i32
  }
  func.func @transform_2(%arg0: i32) -> (i32, i32, i32) {
    %c0_i32 = arith.constant 0 : i32
    %c0_i32_0 = arith.constant 0 : i32
    %c0_i32_1 = arith.constant 0 : i32
    return %arg0, %c0_i32, %c0_i32_0 : i32, i32, i32
  }
}

</mosaic_0001>

<bundles_post_ra>
// kernel: label_smooth_cross_entropy.1
= control target key start
LH: loop header
LB: loop body
LE: loop exit
PB: predicated region body
PF: predicated region fallthrough
CT: control target
= control target key end

     0   :  { %7 = vsyncpa [#allocation3], 0  ;;  %s242_s0 = inlined_call_operand.hbm [shape: f32[8,32], index: 0, kind: input, shape index: {}]   ;;  %s243_s1 = inlined_call_operand.hbm [shape: s32[8,1], index: 1, kind: input, shape index: {}]   ;;  %s244_s2 = inlined_call_operand.hbm [shape: f32[1,8,128], index: 2, kind: output, shape index: {}]  }
   0x1   :  { %8 = vsyncpa [#allocation6], 0 }
   0x2   :  { %9 = vsyncpa [#allocation4], 0  ;;  %s183_s9 = smov [#allocation2]   ;;  %s184_s11 = smov [#allocation5]  }
   0x3   :  { %s16_s10 = sshll.u32 %s183_s9, 4  ;;  %s26_s12 = sshll.u32 %s184_s11, 4  ;;  %s17_s10 = int_to_ptr.vmem [resolvable:$true] %s16_s10  ;;  %s27_s12 = int_to_ptr.vmem [resolvable:$true] %s26_s12 }
   0x4   :  { %s111_s15 = scalar_lea.hbm %s242_s0, 128 }
   0x5   :  { %p112_p0 = scmp.ne.s32.totalorder %s242_s0, %s111_s15  ;;  %p115_p1 = scmp.lt.u32.totalorder %s111_s15, %s242_s0 }
   0x7   :  { %p117_p2 = pnand %p115_p1, %p112_p0 }
   0x9   :  { %120 = shalt.err (!%p117_p2)
}
   0xa   :  { %s121_s20 = scalar_lea.vmem %s17_s10, 128  ;;  %p126_p4 = scmp.lt.s32.totalorder %s17_s10, %s17_s10 }
   0xb   :  { %p122_p3 = scmp.ne.s32.totalorder %s17_s10, %s121_s20  ;;  %p127_p5 = scmp.lt.s32.totalorder %s121_s20, %s121_s20 }
   0xd   :  { %p128_p6 = por %p127_p5, %p126_p4 }
   0xf   :  { %p129_p7 = pnand %p128_p6, %p122_p3 }
  0x11   :  { %132 = shalt.err (!%p129_p7)
}
  0x12   :  { %19 = dma.hbm_to_vmem [thread:$0]  %s242_s0, 128, %s17_s10, [#allocation3]  }
  0x13   :  { %s133_s25 = scalar_lea.hbm %s243_s1, 128 }
  0x14   :  { %p134_p8 = scmp.ne.s32.totalorder %s243_s1, %s133_s25  ;;  %p137_p9 = scmp.lt.u32.totalorder %s133_s25, %s243_s1 }
  0x16   :  { %p139_p10 = pnand %p137_p9, %p134_p8 }
  0x18   :  { %142 = shalt.err (!%p139_p10)
}
  0x19   :  { %s143_s30 = scalar_lea.vmem %s27_s12, 128  ;;  %p148_p12 = scmp.lt.s32.totalorder %s27_s12, %s27_s12 }
  0x1a   :  { %p144_p11 = scmp.ne.s32.totalorder %s27_s12, %s143_s30  ;;  %p149_p13 = scmp.lt.s32.totalorder %s143_s30, %s143_s30 }
  0x1c   :  { %p150_p0 = por %p149_p13, %p148_p12 }
  0x1e   :  { %p151_p1 = pnand %p150_p0, %p144_p11 }
  0x20   :  { %154 = shalt.err (!%p151_p1)
}
  0x21   :  { %29 = dma.hbm_to_vmem [thread:$0]  %s243_s1, 128, %s27_s12, [#allocation6]  }
  0x22   :  { %177 = dma.done.wait [#allocation3], 128  }
  0x23   :  { %178 = vsyncadd [#allocation3], 4294967168 }
  0x24   :  { %179 = dma.done.wait [#allocation6], 128  }
  0x25   :  { %180 = vsyncadd [#allocation6], 4294967168  ;;  %v185_v0 = vmov 0   ;;  %vm38_vm0 = vcmask 261120   ;;  %v36_v1 = vld [vmem:[#allocation2] sm:$0xff]  ;;  %v37_v3 = vld [vmem:[#allocation5] sm:$0xff]  ;;  %v50_v6 = vlaneseq }
  0x26   :  { %106 = vset.pattern.permute.xlu0 %v185_v0  ;;  %v39_v2 = vsel %vm38_vm0, %v36_v1, -inf  ;;  %v186_v10 = vmov 0.003125   ;;  %vm70_vm2 = vcmask 7168   ;;  %s187_s1 = smov [#allocation7]  }
  0x27   :  { %40 = vmax.xlane.f32.xlu0 %v39_v2  ;;  %v51_v8 = vand.u32 127, %v50_v6  ;;  %s89_s4 = sshll.u32 %s187_s1, 4  ;;  %s90_s4 = int_to_ptr.vmem [resolvable:$true] %s89_s4 }
  0x28   :  { %s155_s6 = scalar_lea.vmem %s90_s4, 128  ;;  %p160_p3 = scmp.lt.s32.totalorder %s90_s4, %s90_s4 }
  0x29   :  { %p156_p2 = scmp.ne.s32.totalorder %s90_s4, %s155_s6  ;;  %p161_p4 = scmp.lt.s32.totalorder %s155_s6, %s155_s6 }
  0x2b   :  { %p162_p5 = por %p161_p4, %p160_p3 }
  0x2d   :  { %p163_p6 = pnand %p162_p5, %p156_p2 }
  0x3d   :  { %53 = vperm.xlu0 %106, %v37_v3  }
  0xb4   :  { %v41_v4 = vpop.xlane.xlu0 %40 }
  0xb5   :  { %v42_v5 = vsub.f32 %v36_v1, %v41_v4 }
  0xb7   :  { %v43_v7 = vmul.f32 1.442695, %v42_v5 }
  0xb9   :  { %107 = vpow2.f32 %v43_v7 }
  0xbc   :  { %v54_v9 = vpop.permute.xlu0 %53 }
  0xbd   :  { %vm55_vm1 = vcmp.eq.s32.totalorder %v51_v8, %v54_v9 }
  0xbe   :  { %v56_v11 = vsel %vm55_vm1, 0.903125, %v186_v10 }
  0xbf   :  { %v57_v12 = vmul.f32 %v56_v11, %v36_v1 }
  0xc1   :  { %v58_v15 = vsel %vm38_vm0, %v57_v12, 0.0 }
  0xc3   :  { %v108_v13 = vpop.eup %107 }
  0xc4   :  { %v45_v14 = vsel %vm38_vm0, %v108_v13, 0.0 }
  0xc5   :  { %46 = vadd.xlane.f32.xlu1 %v45_v14 }
  0xc9   :  { %59 = vadd.xlane.f32.xlu1 %v58_v15 }
 0x152   :  { %v47_v16 = vpop.xlane.xlu1 %46 }
 0x153   :  { %109 = vlog2.f32 %v47_v16 }
 0x156   :  { %v60_v19 = vpop.xlane.xlu1 %59 }
 0x15d   :  { %v110_v17 = vpop.eup %109 }
 0x15e   :  { %v49_v18 = vmul.f32 0.6931472, %v110_v17 }
 0x160   :  { %v61_v20 = vadd.f32 %v49_v18, %v41_v4 }
 0x162   :  { %v62_v21 = vsub.f32 %v61_v20, %v60_v19 }
 0x164   :  { %v71_v22 = vsel %vm70_vm2, %v62_v21, 0.0 }
 0x165   :  { %72 = vadd.xlane.f32.xlu1 %v71_v22 }
 0x1f2   :  { %v73_v23 = vpop.xlane.xlu1 %72 }
 0x1f3   :  { %v74_v24 = vrot.slane %v73_v23, 4 }
 0x1f5   :  { %v75_v25 = vadd.f32 %v74_v24, %v73_v23 }
 0x1f7   :  { %v76_v26 = vrot.slane %v75_v25, 2 }
 0x1f9   :  { %v77_v27 = vadd.f32 %v76_v26, %v75_v25 }
 0x1fb   :  { %v78_v28 = vrot.slane %v77_v27, 1 }
 0x1fd   :  { %v79_v29 = vadd.f32 %v78_v28, %v77_v27 }
 0x1ff   :  { %99 = vpush %v79_v29 }
 0x230   :  { %s100_s5 = spop %99 }
 0x231   :  { %v81_v30 = vstv %s100_s5 }
 0x232   :  { %82 = vst [vmem:[#allocation7] sm:$0xff] %v81_v30 }
 0x233   :  { %166 = shalt.err (!%p163_p6)
}
 0x234   :  { %s167_s9 = scalar_lea.hbm %s244_s2, 128 }
 0x235   :  { %p168_p7 = scmp.ne.s32.totalorder %s244_s2, %s167_s9  ;;  %p171_p8 = scmp.lt.u32.totalorder %s167_s9, %s244_s2 }
 0x237   :  { %p173_p9 = pnand %p171_p8, %p168_p7 }
 0x239   :  { %176 = shalt.err (!%p173_p9)
}
 0x23a   :  { %92 = dma.vmem_to_hbm [thread:$0]  %s90_s4, 128, %s244_s2, [#allocation4]  }
 0x23b   :  { %181 = dma.done.wait [#allocation4], 128  }
 0x23c   :  { %182 = vsyncadd [#allocation4], 4294967168 }
 0x23d   :  { %96 = vsyncpa [#allocation3], 1 }
 0x23e   :  { %97 = vsyncpa [#allocation6], 1 }
 0x23f   :  { %98 = vsyncpa [#allocation4], 1 }

</bundles_post_ra>
